<compile_context>
chip_gen: v7x
topology: tpu7x:2x2x1
jax: 0.10.0
libtpu: 0.0.40
codegen_flags: <defaults>
</compile_context>

<pallas_src>
import jax
import jax.numpy as jnp
from jax import lax
from jax.experimental import pallas as pl
from jax.experimental.pallas import tpu as pltpu


def _v1t_f32(x2_ref, h_ref):
    # v1 = x2 @ h^T  =>  v1^T = h @ x2^T, expressed as a contracting-last-dim
    # dot_general so Mosaic feeds the MXU with the transposed operand directly.
    return lax.dot_general(
        h_ref[...],
        x2_ref[...],
        dimension_numbers=(((1,), (1,)), ((), ())),
        preferred_element_type=jnp.float32,
    )


def _fwd_v2_only_kernel(x1_ref, x2_ref, h_ref, v2_ref):
    # inp_c is None path: only v2 is produced (no wasted v1^T writeback).
    v1t = _v1t_f32(x2_ref, h_ref)
    v2_ref[...] = (x1_ref[...].astype(jnp.float32) + v1t).astype(v2_ref.dtype)


def _fwd_both_kernel(x1_ref, x2_ref, h_ref, v2_ref, v1t_ref):
    # inp_c present path: two independent outputs (no stacked slab + slices).
    v1t = _v1t_f32(x2_ref, h_ref)
    v2_ref[...] = (x1_ref[...].astype(jnp.float32) + v1t).astype(v2_ref.dtype)
    v1t_ref[...] = v1t.astype(v1t_ref.dtype)


def model_forward(x1, x2, inp_h, inp_c=None):
    """Pallas equivalent of Model.forward for a single instance."""
    C, A = x1.shape          # (6, 48)
    A2, B = x2.shape         # (48, 32)
    C2, B2 = inp_h.shape     # (6, 32)
    assert A == A2 and B == B2 and C == C2, "inconsistent input shapes"

    out_dtype = jnp.result_type(x1.dtype, x2.dtype, inp_h.dtype)

    in_specs = [
        pl.BlockSpec((C, A), lambda: (0, 0)),   # x1
        pl.BlockSpec((A, B), lambda: (0, 0)),   # x2
        pl.BlockSpec((C, B), lambda: (0, 0)),   # inp_h
    ]

    if inp_c is None:
        return pl.pallas_call(
            _fwd_v2_only_kernel,
            out_shape=jax.ShapeDtypeStruct((C, A), out_dtype),
            in_specs=in_specs,
            out_specs=pl.BlockSpec((C, A), lambda: (0, 0)),
        )(x1, x2, inp_h)

    v2, v1t = pl.pallas_call(
        _fwd_both_kernel,
        out_shape=(
            jax.ShapeDtypeStruct((C, A), out_dtype),
            jax.ShapeDtypeStruct((C, A), out_dtype),
        ),
        in_specs=in_specs,
        out_specs=(
            pl.BlockSpec((C, A), lambda: (0, 0)),
            pl.BlockSpec((C, A), lambda: (0, 0)),
        ),
    )(x1, x2, inp_h)
    return (v2, v1t)


def model_forward_batched(x1_b, x2, inp_h_b):
    """Batched variant: N independent (x1, inp_h) instances in one pallas_call.

    x1_b:    (N, C, A)
    x2:      (A, B)     (shared)
    inp_h_b: (N, C, B)
    Returns (v2_b, v1t_b), each (N, C, A).

    A leading "parallel" grid axis amortizes the launch/DMA overhead (the
    actual bottleneck at these sizes) and shards steps across both
    TensorCores on v7x.
    """
    N, C, A = x1_b.shape
    A2, B = x2.shape
    N2, C2, B2 = inp_h_b.shape
    assert A == A2 and B == B2 and C == C2 and N == N2, "inconsistent shapes"

    out_dtype = jnp.result_type(x1_b.dtype, x2.dtype, inp_h_b.dtype)

    v2_b, v1t_b = pl.pallas_call(
        _fwd_both_kernel,   # leading batch dim squeezed away -> same body
        out_shape=(
            jax.ShapeDtypeStruct((N, C, A), out_dtype),
            jax.ShapeDtypeStruct((N, C, A), out_dtype),
        ),
        grid=(N,),
        in_specs=[
            pl.BlockSpec((None, C, A), lambda n: (n, 0, 0)),   # x1 (per step)
            pl.BlockSpec((A, B), lambda n: (0, 0)),            # x2 (shared)
            pl.BlockSpec((None, C, B), lambda n: (n, 0, 0)),   # inp_h
        ],
        out_specs=(
            pl.BlockSpec((None, C, A), lambda n: (n, 0, 0)),
            pl.BlockSpec((None, C, A), lambda n: (n, 0, 0)),
        ),
        compiler_params=pltpu.CompilerParams(
            dimension_semantics=("parallel",)
        ),
    )(x1_b, x2, inp_h_b)
    return (v2_b, v1t_b)


if __name__ == "__main__":
    key = jax.random.PRNGKey(0)
    k1, k2, k3, k4, k5, k6 = jax.random.split(key, 6)

    # Small shapes consistent with the forward pass.
    C, A, B = 6, 48, 32
    x1 = jax.random.normal(k1, (C, A), dtype=jnp.float32)
    x2 = jax.random.normal(k2, (A, B), dtype=jnp.float32)
    inp_h = jax.random.normal(k3, (C, B), dtype=jnp.float32)
    inp_c = jax.random.normal(k4, (C, B), dtype=jnp.float32)

    # Pure-JAX reference.
    v1_ref = x2 @ inp_h.T
    v1t_ref = v1_ref.T
    v2_ref = x1 + v1t_ref

    # Branch with inp_c present -> (v2, v1^T), two real outputs.
    v2, v1t = model_forward(x1, x2, inp_h, inp_c)
    jax.block_until_ready((v2, v1t))
    assert jnp.allclose(v2, v2_ref, atol=1e-4, rtol=1e-4)
    assert jnp.allclose(v1t, v1t_ref, atol=1e-4, rtol=1e-4)

    # Branch with inp_c is None -> v2 only (v1^T never computed/stored).
    v2_only = model_forward(x1, x2, inp_h, None)
    jax.block_until_ready(v2_only)
    assert jnp.allclose(v2_only, v2_ref, atol=1e-4, rtol=1e-4)

    # Batched variant: N instances amortized into one launch.
    N = 4
    x1_b = jax.random.normal(k5, (N, C, A), dtype=jnp.float32)
    inp_h_b = jax.random.normal(k6, (N, C, B), dtype=jnp.float32)
    v2_b, v1t_b = model_forward_batched(x1_b, x2, inp_h_b)
    jax.block_until_ready((v2_b, v1t_b))
    v1t_b_ref = jnp.einsum("ncb,ab->nca", inp_h_b, x2)
    v2_b_ref = x1_b + v1t_b_ref
    assert jnp.allclose(v2_b, v2_b_ref, atol=1e-4, rtol=1e-4)
    assert jnp.allclose(v1t_b, v1t_b_ref, atol=1e-4, rtol=1e-4)

    print("KERNEL_OK")
</pallas_src>

<mosaic_0001>
module attributes {stable_mosaic.version = 11 : i64} {
  func.func @_fwd_both_kernel(%arg0: memref<6x48xf32, #tpu.memory_space<vmem>>, %arg1: memref<48x32xf32, #tpu.memory_space<vmem>>, %arg2: memref<6x32xf32, #tpu.memory_space<vmem>>, %arg3: memref<6x48xf32, #tpu.memory_space<vmem>>, %arg4: memref<6x48xf32, #tpu.memory_space<vmem>>) attributes {dimension_semantics = [], scalar_prefetch = 0 : i64, scratch_operands = 0 : i64, tpu.core_type = #tpu.core_type<tc>} {
    %c0 = arith.constant 0 : index
    %c0_0 = arith.constant 0 : index
    %0 = vector.load %arg2[%c0, %c0_0] : memref<6x32xf32, #tpu.memory_space<vmem>>, vector<6x32xf32>
    %c0_1 = arith.constant 0 : index
    %c0_2 = arith.constant 0 : index
    %1 = vector.load %arg1[%c0_1, %c0_2] : memref<48x32xf32, #tpu.memory_space<vmem>>, vector<48x32xf32>
    %cst = arith.constant dense<0.000000e+00> : vector<6x48xf32>
    %2 = tpu.matmul %0, %1, %cst {dimension_numbers = #tpu.dot_dimension_numbers<[1], [1], [0], [0], [0, 0, 1, 0], [], []>} : vector<6x32xf32>, vector<48x32xf32>, vector<6x48xf32> -> vector<6x48xf32>
    %c0_3 = arith.constant 0 : index
    %c0_4 = arith.constant 0 : index
    %3 = vector.load %arg0[%c0_3, %c0_4] : memref<6x48xf32, #tpu.memory_space<vmem>>, vector<6x48xf32>
    %4 = arith.addf %3, %2 : vector<6x48xf32>
    %c0_5 = arith.constant 0 : index
    %c0_6 = arith.constant 0 : index
    %5 = vector.load %arg3[%c0_5, %c0_6] : memref<6x48xf32, #tpu.memory_space<vmem>>, vector<6x48xf32>
    tpu.vector_store %arg3[%c0_5, %c0_6], %4 {strides = array<i32>} : memref<6x48xf32, #tpu.memory_space<vmem>>, vector<6x48xf32>,
    %c0_7 = arith.constant 0 : index
    %c0_8 = arith.constant 0 : index
    %6 = vector.load %arg4[%c0_7, %c0_8] : memref<6x48xf32, #tpu.memory_space<vmem>>, vector<6x48xf32>
    tpu.vector_store %arg4[%c0_7, %c0_8], %2 {strides = array<i32>} : memref<6x48xf32, #tpu.memory_space<vmem>>, vector<6x48xf32>,
    return
  }
}

</mosaic_0001>

<bundles_post_ra>
// kernel: tpu_custom_call.1
= control target key start
LH: loop header
LB: loop body
LE: loop exit
PB: predicated region body
PF: predicated region fallthrough
CT: control target
= control target key end

     0   :  { %10 = vsyncpa [#allocation3], 0  ;;  %vm25_vm0 = vcmask 261120   ;;  %v244_v2 = vmov 0.0|0.0   ;;  %vm245_vm2 = vmmov 0   ;;  %v246_v4 = vmov 0.0   ;;  %s327_s0 = inlined_call_operand.vmem [shape: f32[6,48], index: 0, kind: input, shape index: {}]   ;;  %s328_s1 = inlined_call_operand.vmem [shape: f32[48,32], index: 1, kind: input, shape index: {}]   ;;  %s329_s2 = inlined_call_operand.vmem [shape: f32[6,32], index: 2, kind: input, shape index: {}]   ;;  %s330_s3 = inlined_call_operand.hbm [shape: f32[6,48], index: 3, kind: output, shape index: {0}]   ;;  %s331_s4 = inlined_call_operand.hbm [shape: f32[6,48], index: 4, kind: output, shape index: {1}]  }
   0x1   :  { %v19_v0 = vld [vmem:[%s328_s1] sm:$0xff]  ;;  %v20_v1 = vld [vmem:[%s328_s1 + $0x8] sm:$0xff]  ;;  %179 = vmatprep.subr.bf16.mxu0 %v244_v2  ;;  %vm181_vm1 = vmpackc.low %vm25_vm0, %vm25_vm0  ;;  %176 = vmatprep.mubr.msk.f32.mxu0 %vm245_vm2, %v246_v4 }
   0x2   :  { %v180_v3 = vpack.c.bf16 %v20_v1, %v19_v0 }
   0x3   :  { %11 = vsyncpa [#allocation5], 0  ;;  %v21_v5 = vld [vmem:[%s328_s1 + $0x10] sm:$0xff]  ;;  %v22_v6 = vld [vmem:[%s328_s1 + $0x18] sm:$0xff]  ;;  %s247_s29 = smov [#allocation4]   ;;  %vm119_vm3 = vcmask 390144  }
   0x4   :  { %182 = vmatpush3.bf16.xpose.msk.msra.mxu0 %vm181_vm1, %v180_v3  ;;  %v184_v7 = vpack.c.bf16 %v22_v6, %v21_v5  ;;  %v23_v8 = vld [vmem:[%s328_s1 + $0x20] sm:$0xff]  ;;  %v24_v9 = vld [vmem:[%s328_s1 + $0x28] sm:$0xff]  ;;  %s138_s30 = sshll.u32 %s247_s29, 4  ;;  %s248_s7 = smov [#allocation2]   ;;  %s139_s30 = int_to_ptr.vmem [resolvable:$true] %s138_s30 }
   0x5   :  { %183 = vmatprep.subr.bf16.mxu0 %v244_v2  ;;  %v188_v10 = vpack.c.bf16 %v24_v9, %v23_v8  ;;  %v18_v11 = vld [vmem:[%s329_s2] sm:$0x3f]  ;;  %s128_s8 = sshll.u32 %s248_s7, 4  ;;  %s196_s1 = scalar_lea.vmem %s139_s30, 128  ;;  %s129_s8 = int_to_ptr.vmem [resolvable:$true] %s128_s8 }
   0x6   :  { %v117_v12 = vld [vmem:[%s327_s0] sm:$0x3f]  ;;  %p197_p0 = scmp.ne.s32.totalorder %s139_s30, %s196_s1  ;;  %p201_p1 = scmp.lt.s32.totalorder %s139_s30, %s139_s30 }
   0x7   :  { %p202_p2 = scmp.lt.s32.totalorder %s196_s1, %s196_s1 }
   0x9   :  { %p203_p3 = por %p202_p2, %p201_p1 }
   0xb   :  { %p204_p4 = pnand %p203_p3, %p197_p0 }
   0xc   :  { %186 = vmatpush3.bf16.xpose.msk.msra.mxu0 %vm181_vm1, %v184_v7 }
   0xd   :  { %187 = vmatprep.subr.bf16.mxu0 %v244_v2 }
  0x14   :  { %190 = vmatpush3.bf16.xpose.msk.msra.mxu0 %vm181_vm1, %v188_v10 }
  0x1b   :  { %177 = vmatmul.mubr.msk.f32.vlgmr.msra.gmra.mrb[0].mxu0 %vm25_vm0, %v18_v11 }
  0xee   :  { %v113_v13 = vpop.f32.mrb[0].mxu0 }
  0xef   :  { %v118_v14 = vadd.f32 %v117_v12, %v113_v13  ;;  %v178_v15 = vpop.f32.mrb[1].mxu0  ;;  %121 = vst.msk [vmem:[#allocation4] sm:$0x3f] %vm119_vm3, %v113_v13 }
  0xf0   :  { %207 = shalt.err (!%p204_p4)
}
  0xf1   :  { %s208_s0 = scalar_lea.hbm %s331_s4, 128 }
  0xf2   :  { %p209_p5 = scmp.ne.s32.totalorder %s331_s4, %s208_s0  ;;  %p212_p6 = scmp.lt.u32.totalorder %s208_s0, %s331_s4 }
  0xf4   :  { %p214_p7 = pnand %p212_p6, %p209_p5 }
  0xf6   :  { %217 = shalt.err (!%p214_p7)
}
  0xf7   :  { %141 = dma.vmem_to_hbm [thread:$0]  %s139_s30, 128, %s331_s4, [#allocation5]   ;;  %120 = vst.msk [vmem:[#allocation2] sm:$0x3f] %vm119_vm3, %v118_v14 }
  0xf8   :  { %s218_s16 = scalar_lea.vmem %s129_s8, 128  ;;  %p223_p9 = scmp.lt.s32.totalorder %s129_s8, %s129_s8 }
  0xf9   :  { %p219_p8 = scmp.ne.s32.totalorder %s129_s8, %s218_s16  ;;  %p224_p10 = scmp.lt.s32.totalorder %s218_s16, %s218_s16 }
  0xfb   :  { %p225_p11 = por %p224_p10, %p223_p9 }
  0xfd   :  { %p226_p12 = pnand %p225_p11, %p219_p8 }
  0xff   :  { %229 = shalt.err (!%p226_p12)
}
 0x100   :  { %s230_s19 = scalar_lea.hbm %s330_s3, 128 }
 0x101   :  { %p231_p13 = scmp.ne.s32.totalorder %s330_s3, %s230_s19  ;;  %p234_p0 = scmp.lt.u32.totalorder %s230_s19, %s330_s3 }
 0x103   :  { %p236_p1 = pnand %p234_p0, %p231_p13 }
 0x105   :  { %239 = shalt.err (!%p236_p1)
}
 0x106   :  { %131 = dma.vmem_to_hbm [thread:$0]  %s129_s8, 128, %s330_s3, [#allocation3]  }
 0x107   :  { %240 = dma.done.wait [#allocation3], 128  }
 0x108   :  { %241 = vsyncadd [#allocation3], 4294967168 }
 0x109   :  { %242 = dma.done.wait [#allocation5], 128  }
 0x10a   :  { %243 = vsyncadd [#allocation5], 4294967168 }
 0x10b   :  { %148 = vsyncpa [#allocation3], 1 }
 0x10c   :  { %149 = vsyncpa [#allocation5], 1 }

</bundles_post_ra>
